<compile_context>
chip_gen: v5e
topology: v5e:2x2
jax: 0.10.0
libtpu: 0.0.40
codegen_flags: <defaults>
</compile_context>

<pallas_src>
import functools

import jax
import jax.numpy as jnp
from jax.experimental import pallas as pl
from jax.experimental.pallas import tpu as pltpu

LANE = 128      # TPU lane width
SUBLANE = 8     # f32 sublane tile


def _round_up(x, m):
    return ((x + m - 1) // m) * m


def _actor_critic_kernel(state_ref, p_ref, out_ref, *, s_pad, width):
    """One batch tile: out = relu(relu(x @ W1 + b1) @ W2f + b2f) @ W3blk + b3f."""
    # Static, sublane-aligned slices into the packed parameter slab.
    w1 = p_ref[0:s_pad, :]                              # [S_pad, width]
    w2 = p_ref[s_pad:s_pad + width, :]                  # [width, width] fused hidden
    w3 = p_ref[s_pad + width:s_pad + 2 * width, :]      # [width, width] block-diag out
    boff = s_pad + 2 * width
    b1 = p_ref[boff + 0:boff + 1, :]                    # [1, width]
    b2 = p_ref[boff + 1:boff + 2, :]
    b3 = p_ref[boff + 2:boff + 3, :]

    x = state_ref[...]                                  # [TB, S_pad]
    feats = jnp.maximum(
        jnp.dot(x, w1, preferred_element_type=jnp.float32) + b1, 0.0)
    hidden = jnp.maximum(
        jnp.dot(feats, w2, preferred_element_type=jnp.float32) + b2, 0.0)
    out = jnp.dot(hidden, w3, preferred_element_type=jnp.float32) + b3
    out_ref[...] = out.astype(out_ref.dtype)


def pack_params(params, state_dim, action_dim, hidden_dim):
    """Pack all weights/biases into one zero-padded [rows, width] f32 slab."""
    H, A = hidden_dim, action_dim
    s_pad = _round_up(max(state_dim, SUBLANE), SUBLANE)
    width = _round_up(max(2 * H, A + 1), LANE)

    # feature extractor weight, padded.
    w1p = jnp.zeros((s_pad, width), jnp.float32).at[:state_dim, :H].set(params["w1"])

    # fused actor/critic hidden weight: [H, 2H] -> padded [width, width].
    w2f = jnp.concatenate([params["w2a"], params["w2c"]], axis=1)          # [H, 2H]
    w2p = jnp.zeros((width, width), jnp.float32).at[:H, :2 * H].set(w2f)

    # block-diagonal output weight: [:H, :A] = W3a (actor), [H:2H, A] = W3c (critic).
    w3p = jnp.zeros((width, width), jnp.float32)
    w3p = w3p.at[:H, :A].set(params["w3a"])
    w3p = w3p.at[H:2 * H, A:A + 1].set(params["w3c"])

    # biases, each padded to a full lane row.
    b1p = jnp.zeros((1, width), jnp.float32).at[:, :H].set(params["b1"])
    b2f = jnp.concatenate([params["b2a"], params["b2c"]], axis=1)          # [1, 2H]
    b2p = jnp.zeros((1, width), jnp.float32).at[:, :2 * H].set(b2f)
    b3f = jnp.concatenate([params["b3a"], params["b3c"]], axis=1)          # [1, A+1]
    b3p = jnp.zeros((1, width), jnp.float32).at[:, :A + 1].set(b3f)
    bias_rows = jnp.concatenate(
        [b1p, b2p, b3p, jnp.zeros((SUBLANE - 3, width), jnp.float32)], axis=0)

    slab = jnp.concatenate([w1p, w2p, w3p, bias_rows], axis=0)
    return slab, s_pad, width


def actor_critic_forward(state, params, *, batch_tile=256):
    """forward(state) -> (action_mean [B, A], action_std [1, A], value [B, 1])."""
    B, S = state.shape
    H = params["w1"].shape[1]
    A = params["w3a"].shape[1]

    slab, s_pad, width = pack_params(params, S, A, H)

    # Batch tiling: pad B so an integral number of sublane-aligned tiles covers it.
    b_pad = _round_up(max(B, SUBLANE), SUBLANE)
    tb = _round_up(min(batch_tile, b_pad), SUBLANE)
    b_pad = _round_up(b_pad, tb)
    grid = (b_pad // tb,)

    state_p = jnp.zeros((b_pad, s_pad), jnp.float32).at[:B, :S].set(
        state.astype(jnp.float32))

    kernel = functools.partial(_actor_critic_kernel, s_pad=s_pad, width=width)

    out = pl.pallas_call(
        kernel,
        out_shape=jax.ShapeDtypeStruct((b_pad, width), jnp.float32),
        grid=grid,
        in_specs=[
            pl.BlockSpec((tb, s_pad), lambda i: (i, 0)),        # streamed batch tiles
            pl.BlockSpec(slab.shape, lambda i: (0, 0)),          # VMEM-resident params
        ],
        out_specs=pl.BlockSpec((tb, width), lambda i: (i, 0)),   # lane-dense output slab
        compiler_params=pltpu.CompilerParams(
            dimension_semantics=("parallel",)),
    )(state_p, slab)

    action_mean = out[:B, :A]
    value = out[:B, A:A + 1]
    # exp(log_std) does not depend on state -> hoisted out of the kernel.
    action_std = jnp.exp(params["log_std"])
    return action_mean, action_std, value


def init_params(key, state_dim, action_dim, hidden_dim):
    """Deterministic parameter init (synthetic; shapes match nn.Linear layers)."""
    ks = jax.random.split(key, 10)

    def lin(kw, kb, fan_in, fan_out):
        bound = 1.0 / jnp.sqrt(fan_in)
        w = jax.random.uniform(kw, (fan_in, fan_out), jnp.float32, -bound, bound)
        b = jax.random.uniform(kb, (1, fan_out), jnp.float32, -bound, bound)
        return w, b

    w1, b1 = lin(ks[0], ks[1], state_dim, hidden_dim)
    w2a, b2a = lin(ks[2], ks[3], hidden_dim, hidden_dim)
    w3a, b3a = lin(ks[4], ks[5], hidden_dim, action_dim)
    w2c, b2c = lin(ks[6], ks[7], hidden_dim, hidden_dim)
    w3c, b3c = lin(ks[8], ks[9], hidden_dim, 1)
    log_std = jnp.zeros((1, action_dim), jnp.float32)  # nn.Parameter(torch.zeros(1, A))

    return dict(
        w1=w1, b1=b1,
        w2a=w2a, b2a=b2a, w3a=w3a, b3a=b3a,
        w2c=w2c, b2c=b2c, w3c=w3c, b3c=b3c,
        log_std=log_std,
    )


def reference_forward(state, p):
    """Pure-JAX reference for correctness checking."""
    feats = jnp.maximum(state @ p["w1"] + p["b1"], 0.0)
    ah = jnp.maximum(feats @ p["w2a"] + p["b2a"], 0.0)
    mean = ah @ p["w3a"] + p["b3a"]
    std = jnp.exp(p["log_std"])
    ch = jnp.maximum(feats @ p["w2c"] + p["b2c"], 0.0)
    value = ch @ p["w3c"] + p["b3c"]
    return mean, std, value


if __name__ == "__main__":
    # Small shapes consistent with the module: batch=4, state_dim=8,
    # action_dim=2, hidden_dim=32.
    B, S, A, H = 4, 8, 2, 32

    key = jax.random.PRNGKey(0)
    k_state, k_params, k_big = jax.random.split(key, 3)

    state = jax.random.normal(k_state, (B, S), jnp.float32)
    params = init_params(k_params, S, A, H)

    forward = jax.jit(actor_critic_forward)

    mean, std, value = forward(state, params)
    jax.block_until_ready((mean, std, value))

    # sanity check against pure-JAX reference
    r_mean, r_std, r_value = reference_forward(state, params)
    assert mean.shape == (B, A) and std.shape == (1, A) and value.shape == (B, 1)
    assert jnp.allclose(mean, r_mean, atol=1e-5), "action_mean mismatch"
    assert jnp.allclose(std, r_std, atol=1e-6), "action_std mismatch"
    assert jnp.allclose(value, r_value, atol=1e-5), "value mismatch"

    # exercise the multi-tile batched path with a ragged batch size
    B2 = 300
    state2 = jax.random.normal(k_big, (B2, S), jnp.float32)
    mean2, std2, value2 = forward(state2, params)
    jax.block_until_ready((mean2, std2, value2))
    r_mean2, r_std2, r_value2 = reference_forward(state2, params)
    assert mean2.shape == (B2, A) and value2.shape == (B2, 1)
    assert jnp.allclose(mean2, r_mean2, atol=1e-5), "batched action_mean mismatch"
    assert jnp.allclose(value2, r_value2, atol=1e-5), "batched value mismatch"

    print("KERNEL_OK")
</pallas_src>

<mosaic_0001>
module attributes {stable_mosaic.version = 11 : i64} {
  func.func @_actor_critic_kernel(%arg0: i32, %arg1: memref<8x8xf32, #tpu.memory_space<vmem>>, %arg2: memref<272x128xf32, #tpu.memory_space<vmem>>, %arg3: memref<8x128xf32, #tpu.memory_space<vmem>>) attributes {dimension_semantics = [#tpu.dimension_semantics<parallel>], iteration_bounds = array<i64: 1>, scalar_prefetch = 0 : i64, scratch_operands = 0 : i64, tpu.core_type = #tpu.core_type<tc>, window_params = [{transform_indices = @transform_0, window_bounds = array<i64: 8, 8>}, {pipeline_mode = #tpu.pipeline_mode<synchronous>, transform_indices = @transform_1, window_bounds = array<i64: 272, 128>}, {transform_indices = @transform_2, window_bounds = array<i64: 8, 128>}]} {
    %c0 = arith.constant 0 : index
    %c0_0 = arith.constant 0 : index
    %0 = vector.load %arg2[%c0, %c0_0] : memref<272x128xf32, #tpu.memory_space<vmem>>, vector<8x128xf32>
    %c8 = arith.constant 8 : index
    %c0_1 = arith.constant 0 : index
    %1 = vector.load %arg2[%c8, %c0_1] : memref<272x128xf32, #tpu.memory_space<vmem>>, vector<128x128xf32>
    %c136 = arith.constant 136 : index
    %c0_2 = arith.constant 0 : index
    %2 = vector.load %arg2[%c136, %c0_2] : memref<272x128xf32, #tpu.memory_space<vmem>>, vector<128x128xf32>
    %c264 = arith.constant 264 : index
    %c0_3 = arith.constant 0 : index
    %3 = vector.load %arg2[%c264, %c0_3] : memref<272x128xf32, #tpu.memory_space<vmem>>, vector<1x128xf32>
    %c265 = arith.constant 265 : index
    %c0_4 = arith.constant 0 : index
    %4 = vector.load %arg2[%c265, %c0_4] : memref<272x128xf32, #tpu.memory_space<vmem>>, vector<1x128xf32>
    %c266 = arith.constant 266 : index
    %c0_5 = arith.constant 0 : index
    %5 = vector.load %arg2[%c266, %c0_5] : memref<272x128xf32, #tpu.memory_space<vmem>>, vector<1x128xf32>
    %c0_6 = arith.constant 0 : index
    %c0_7 = arith.constant 0 : index
    %6 = vector.load %arg1[%c0_6, %c0_7] : memref<8x8xf32, #tpu.memory_space<vmem>>, vector<8x8xf32>
    %cst = arith.constant dense<0.000000e+00> : vector<8x128xf32>
    %7 = tpu.matmul %6, %0, %cst {dimension_numbers = #tpu.dot_dimension_numbers<[1], [0], [0], [1], [0, 0, 1, 1], [], []>} : vector<8x8xf32>, vector<8x128xf32>, vector<8x128xf32> -> vector<8x128xf32>
    %8 = vector.broadcast %3 : vector<1x128xf32> to vector<8x128xf32>
    %9 = arith.addf %7, %8 : vector<8x128xf32>
    %cst_8 = arith.constant 0.000000e+00 : f32
    %10 = vector.broadcast %cst_8 : f32 to vector<8x128xf32>
    %11 = arith.maximumf %9, %10 : vector<8x128xf32>
    %cst_9 = arith.constant dense<0.000000e+00> : vector<8x128xf32>
    %12 = tpu.matmul %11, %1, %cst_9 {dimension_numbers = #tpu.dot_dimension_numbers<[1], [0], [0], [1], [0, 0, 1, 1], [], []>} : vector<8x128xf32>, vector<128x128xf32>, vector<8x128xf32> -> vector<8x128xf32>
    %13 = vector.broadcast %4 : vector<1x128xf32> to vector<8x128xf32>
    %14 = arith.addf %12, %13 : vector<8x128xf32>
    %cst_10 = arith.constant 0.000000e+00 : f32
    %15 = vector.broadcast %cst_10 : f32 to vector<8x128xf32>
    %16 = arith.maximumf %14, %15 : vector<8x128xf32>
    %cst_11 = arith.constant dense<0.000000e+00> : vector<8x128xf32>
    %17 = tpu.matmul %16, %2, %cst_11 {dimension_numbers = #tpu.dot_dimension_numbers<[1], [0], [0], [1], [0, 0, 1, 1], [], []>} : vector<8x128xf32>, vector<128x128xf32>, vector<8x128xf32> -> vector<8x128xf32>
    %18 = vector.broadcast %5 : vector<1x128xf32> to vector<8x128xf32>
    %19 = arith.addf %17, %18 : vector<8x128xf32>
    %c0_12 = arith.constant 0 : index
    %c0_13 = arith.constant 0 : index
    %20 = vector.load %arg3[%c0_12, %c0_13] : memref<8x128xf32, #tpu.memory_space<vmem>>, vector<8x128xf32>
    tpu.vector_store %arg3[%c0_12, %c0_13], %19 {strides = array<i32>} : memref<8x128xf32, #tpu.memory_space<vmem>>, vector<8x128xf32>,
    return
  }
  func.func @transform_0(%arg0: i32) -> (i32, i32) {
    %c0_i32 = arith.constant 0 : i32
    %c0_i32_0 = arith.constant 0 : i32
    return %arg0, %c0_i32 : i32, i32
  }
  func.func @transform_1(%arg0: i32) -> (i32, i32) {
    %c0_i32 = arith.constant 0 : i32
    %c0_i32_0 = arith.constant 0 : i32
    %c0_i32_1 = arith.constant 0 : i32
    return %c0_i32, %c0_i32_0 : i32, i32
  }
  func.func @transform_2(%arg0: i32) -> (i32, i32) {
    %c0_i32 = arith.constant 0 : i32
    %c0_i32_0 = arith.constant 0 : i32
    return %arg0, %c0_i32 : i32, i32
  }
}

</mosaic_0001>

<bundles_post_ra>
// kernel: actor_critic_forward.1
= control target key start
LH: loop header
LB: loop body
LE: loop exit
PB: predicated region body
PF: predicated region fallthrough
CT: control target
= control target key end

     0   :  { %vm49_vm0 = vcmask 64512   ;;  %s255_s1 = inlined_call_operand.vmem [shape: f32[272,128], index: 1, kind: input, shape index: {}]   ;;  %s256_s0 = inlined_call_operand.vmem [shape: f32[8,8], index: 0, kind: input, shape index: {}]   ;;  %s257_s2 = inlined_call_operand.vmem [shape: f32[8,128], index: 2, kind: output, shape index: {}]  }
   0x1   :  { %v11_v0 = vld [vmem:[%s255_s1] sm:$0xff]  ;;  %v26_v3 = vld [vmem:[%s255_s1 + $0x78] sm:$0xff]  ;;  %v25_v4 = vld [vmem:[%s255_s1 + $0x70] sm:$0xff] }
   0x2   :  { %v47_v1 = vld [vmem:[%s256_s0] sm:$0xff]  ;;  %68 = vmatpush.msra.mxu0 %v11_v0  ;;  %v24_v5 = vld [vmem:[%s255_s1 + $0x68] sm:$0xff]  ;;  %v22_v7 = vld [vmem:[%s255_s1 + $0x58] sm:$0xff] }
   0x3   :  { %v27_v2 = vld [vmem:[%s255_s1 + $0x80] sm:$0xff]  ;;  %122 = vmatmul.msk.f32.vlgmr.msra.gmra.mxu0 %vm49_vm0, %v47_v1  ;;  %v21_v8 = vld [vmem:[%s255_s1 + $0x50] sm:$0xff]  ;;  %v20_v9 = vld [vmem:[%s255_s1 + $0x48] sm:$0xff] }
   0x4   :  { %75 = vmatpush.msra.mxu1 %v27_v2  ;;  %v23_v6 = vld [vmem:[%s255_s1 + $0x60] sm:$0xff]  ;;  %v18_v11 = vld [vmem:[%s255_s1 + $0x38] sm:$0xff]  ;;  %v17_v12 = vld [vmem:[%s255_s1 + $0x30] sm:$0xff] }
   0x5   :  { %v19_v10 = vld [vmem:[%s255_s1 + $0x40] sm:$0xff]  ;;  %v16_v13 = vld [vmem:[%s255_s1 + $0x28] sm:$0xff]  ;;  %v14_v15 = vld [vmem:[%s255_s1 + $0x18] sm:$0xff] }
   0x6   :  { %76 = vmatpush.msra.mxu1 %v26_v3  ;;  %v15_v14 = vld [vmem:[%s255_s1 + $0x20] sm:$0xff]  ;;  %v13_v16 = vld [vmem:[%s255_s1 + $0x10] sm:$0xff]  ;;  %v12_v17 = vld [vmem:[%s255_s1 + $0x8] sm:$0xff] }
   0x7   :  { %v43_v18 = vld [vmem:[%s255_s1 + $0x100] sm:$0xff]  ;;  %v42_v19 = vld [vmem:[%s255_s1 + $0xf8] sm:$0xff]  ;;  %v41_v20 = vld [vmem:[%s255_s1 + $0xf0] sm:$0xff] }
   0x8   :  { %77 = vmatpush.msra.mxu1 %v25_v4  ;;  %97 = vmatpush.msra.mxu2 %v43_v18  ;;  %v40_v21 = vld [vmem:[%s255_s1 + $0xe8] sm:$0xff]  ;;  %v39_v22 = vld [vmem:[%s255_s1 + $0xe0] sm:$0xff]  ;;  %v38_v23 = vld [vmem:[%s255_s1 + $0xd8] sm:$0xff] }
   0x9   :  { %v37_v24 = vld [vmem:[%s255_s1 + $0xd0] sm:$0xff]  ;;  %v36_v25 = vld [vmem:[%s255_s1 + $0xc8] sm:$0xff]  ;;  %v35_v26 = vld [vmem:[%s255_s1 + $0xc0] sm:$0xff] }
   0xa   :  { %78 = vmatpush.msra.mxu1 %v24_v5  ;;  %98 = vmatpush.msra.mxu2 %v42_v19  ;;  %v34_v27 = vld [vmem:[%s255_s1 + $0xb8] sm:$0xff]  ;;  %v33_v28 = vld [vmem:[%s255_s1 + $0xb0] sm:$0xff]  ;;  %v32_v29 = vld [vmem:[%s255_s1 + $0xa8] sm:$0xff] }
   0xb   :  { %v31_v30 = vld [vmem:[%s255_s1 + $0xa0] sm:$0xff]  ;;  %v123_v31 = vld [vmem:[%s255_s1 + $0x108] ss:$0 sm:$0xff]  ;;  %v30_v35 = vld [vmem:[%s255_s1 + $0x98] sm:$0xff] }
   0xc   :  { %79 = vmatpush.msra.mxu1 %v23_v6  ;;  %99 = vmatpush.msra.mxu2 %v41_v20  ;;  %v29_v36 = vld [vmem:[%s255_s1 + $0x90] sm:$0xff]  ;;  %v28_v37 = vld [vmem:[%s255_s1 + $0x88] sm:$0xff] }
   0xd   :  { %v124_v38 = vld [vmem:[%s255_s1 + $0x109] ss:$0 sm:$0xff]  ;;  %v125_v42 = vld [vmem:[%s255_s1 + $0x10a] ss:$0 sm:$0xff] }
   0xe   :  { %80 = vmatpush.msra.mxu1 %v22_v7  ;;  %100 = vmatpush.msra.mxu2 %v40_v21 }
  0x10   :  { %81 = vmatpush.msra.mxu1 %v21_v8  ;;  %101 = vmatpush.msra.mxu2 %v39_v22 }
  0x12   :  { %82 = vmatpush.msra.mxu1 %v20_v9  ;;  %102 = vmatpush.msra.mxu2 %v38_v23 }
  0x14   :  { %83 = vmatpush.msra.mxu1 %v19_v10  ;;  %103 = vmatpush.msra.mxu2 %v37_v24 }
  0x16   :  { %84 = vmatpush.msra.mxu1 %v18_v11  ;;  %104 = vmatpush.msra.mxu2 %v36_v25 }
  0x18   :  { %85 = vmatpush.msra.mxu1 %v17_v12  ;;  %105 = vmatpush.msra.mxu2 %v35_v26 }
  0x1a   :  { %86 = vmatpush.msra.mxu1 %v16_v13  ;;  %106 = vmatpush.msra.mxu2 %v34_v27 }
  0x1c   :  { %87 = vmatpush.msra.mxu1 %v15_v14  ;;  %107 = vmatpush.msra.mxu2 %v33_v28 }
  0x1e   :  { %88 = vmatpush.msra.mxu1 %v14_v15  ;;  %108 = vmatpush.msra.mxu2 %v32_v29 }
  0x20   :  { %89 = vmatpush.msra.mxu1 %v13_v16  ;;  %109 = vmatpush.msra.mxu2 %v31_v30 }
  0x22   :  { %90 = vmatpush.msra.mxu1 %v12_v17  ;;  %110 = vmatpush.msra.mxu2 %v30_v35 }
  0x24   :  { %111 = vmatpush.msra.mxu2 %v29_v36 }
  0x26   :  { %112 = vmatpush.msra.mxu2 %v28_v37 }
  0x80   :  { %v70_v32 = vpop.f32.mrf.mxu0 }
  0x81   :  { %v71_v33 = vadd.f32 %v123_v31, %v70_v32 }
  0x83   :  { %v73_v34 = vmax.f32 %v71_v33, 0.0 }
  0x85   :  { %91 = vmatmul.f32.vlgmr.msra.gmra.mxu1 %v73_v34 }
 0x102   :  { %v92_v39 = vpop.f32.mrf.mxu1 }
 0x103   :  { %v93_v40 = vadd.f32 %v124_v38, %v92_v39 }
 0x105   :  { %v95_v41 = vmax.f32 %v93_v40, 0.0 }
 0x107   :  { %113 = vmatmul.f32.vlgmr.msra.gmra.mxu2 %v95_v41 }
 0x18a   :  { %v114_v43 = vpop.f32.mrf.mxu2 }
 0x18b   :  { %v115_v44 = vadd.f32 %v125_v42, %v114_v43 }
 0x18d   :  { %117 = vst [vmem:[%s257_s2] sm:$0xff] %v115_v44 }

</bundles_post_ra>
